<compile_context>
chip_gen: v7x
topology: tpu7x:2x2x1
jax: 0.10.0
libtpu: 0.0.40
codegen_flags: <defaults>
</compile_context>

<pallas_src>
import math

import jax
import jax.numpy as jnp
from jax.experimental import pallas as pl
from jax.experimental.pallas import tpu as pltpu


def pe_kernel(fp_ref, o_ref):
    """Compute one row-tile of the sinusoidal positional-encoding table.

    fp_ref: (2, D)  row 0 = per-column inverse frequency (even/odd pairs share
                    it), row 1 = per-column phase (0 for even cols, pi/2 for
                    odd cols, so a single sin covers both sin and cos).
    o_ref:  (TM, D) output tile: rows = absolute positions, cols = d_model.
    """
    tm, d = o_ref.shape
    row0 = pl.program_id(0) * tm

    # Absolute position of every element in this tile.
    pos = (jax.lax.broadcasted_iota(jnp.int32, (tm, d), 0) + row0).astype(
        jnp.float32
    )
    freq = fp_ref[0:1, :]   # (1, D), broadcast over rows
    phase = fp_ref[1:2, :]  # (1, D)

    # One fused multiply-add + one sin per element (cos(x) == sin(x + pi/2)).
    o_ref[...] = jnp.sin(pos * freq + phase).astype(o_ref.dtype)


def _pick_tile_rows(sp, d_model, budget_bytes=8 << 20):
    """Largest row tile (multiple of 8, divides sp) whose double-buffered
    output stays within a conservative VMEM byte budget (fits v5e's 16 MiB
    default scoped limit and v7x's smaller physical VMEM)."""
    best = 8
    t = 8
    while t <= sp:
        if sp % t == 0 and 2 * t * d_model * 4 <= budget_bytes:
            best = t
        t += 8
    return best


def positional_embedding(x, d_model, max_len=512, *,
                         out_dtype=jnp.float32,
                         single_block_max_bytes=2 << 20):
    """Equivalent of PositionalEmbedding.forward(x): returns pe[:, :x.shape[1]].

    x:        [B, S, ...] — only its static sequence length S is used.
    returns:  [1, S, d_model]  (out_dtype; f32 matches the PyTorch module,
              pass bf16 if the consumer adds PE to bf16 embeddings).

    NOTE: the result depends only on static (S, d_model); compute it once at
    init time and reuse it, exactly like the PyTorch register_buffer.
    """
    S = x.shape[1]
    assert S <= max_len, "sequence length exceeds max_len"
    assert d_model % 2 == 0, "d_model must be even (matches the PyTorch module)"

    # div_term from the PyTorch __init__, expanded so each (even, odd) pair of
    # output columns shares the same frequency; phase row turns cos into sin.
    half_freq = jnp.exp(
        jnp.arange(0, d_model, 2, dtype=jnp.float32)
        * -(math.log(10000.0) / d_model)
    )
    freq_full = jnp.repeat(half_freq, 2)                                 # (D,)
    phase_full = jnp.tile(jnp.array([0.0, math.pi / 2.0], jnp.float32),
                          d_model // 2)                                  # (D,)
    fp = jnp.stack([freq_full, phase_full], axis=0)                      # (2, D)

    out_bytes = S * d_model * jnp.dtype(out_dtype).itemsize

    if out_bytes <= single_block_max_bytes:
        # Single-block path: full-array block is exempt from the (8,128) rule,
        # so no row padding, no wrapper slice, one grid step.
        pe = pl.pallas_call(
            pe_kernel,
            out_shape=jax.ShapeDtypeStruct((S, d_model), out_dtype),
            grid_spec=pltpu.PrefetchScalarGridSpec(
                num_scalar_prefetch=0,
                grid=(1,),
                in_specs=[pl.BlockSpec((2, d_model), lambda i: (0, 0))],
                out_specs=pl.BlockSpec((S, d_model), lambda i: (0, 0)),
            ),
        )(fp)
        return pe[None, :, :]

    # Row-tiled path for big tables: pad rows to a sublane multiple, pick the
    # largest VMEM-budget-friendly tile, split the row axis across cores.
    Sp = ((S + 7) // 8) * 8
    tile_rows = _pick_tile_rows(Sp, d_model)

    pe = pl.pallas_call(
        pe_kernel,
        out_shape=jax.ShapeDtypeStruct((Sp, d_model), out_dtype),
        grid_spec=pltpu.PrefetchScalarGridSpec(
            num_scalar_prefetch=0,
            grid=(Sp // tile_rows,),
            in_specs=[pl.BlockSpec((2, d_model), lambda i: (0, 0))],
            out_specs=pl.BlockSpec((tile_rows, d_model), lambda i: (i, 0)),
        ),
        compiler_params=pltpu.CompilerParams(
            dimension_semantics=("parallel",),
        ),
    )(fp)

    if Sp != S:
        pe = pe[:S]
    return pe[None, :, :]


def reference(seq_len, d_model):
    """Pure-JAX mirror of the PyTorch buffer construction + forward slice."""
    position = jnp.arange(seq_len, dtype=jnp.float32)[:, None]
    div_term = jnp.exp(
        jnp.arange(0, d_model, 2, dtype=jnp.float32)
        * -(math.log(10000.0) / d_model)
    )
    pe = jnp.zeros((seq_len, d_model), jnp.float32)
    pe = pe.at[:, 0::2].set(jnp.sin(position * div_term))
    pe = pe.at[:, 1::2].set(jnp.cos(position * div_term))
    return pe[None, :, :]


if __name__ == "__main__":
    MAX_LEN = 512
    key = jax.random.PRNGKey(0)

    # --- Main small test (single-block path): batch=2, seq=8, d_model=32 ----
    B, S, D = 2, 8, 32
    # forward(x) only uses x's static sequence length, but build a real x to
    # mirror the module's call signature.
    x = jax.random.normal(key, (B, S, D), dtype=jnp.float32)

    out = positional_embedding(x, d_model=D, max_len=MAX_LEN)
    out = jax.block_until_ready(out)
    ref = reference(S, D)
    assert out.shape == (1, S, D)
    assert jnp.allclose(out, ref, atol=1e-4, rtol=1e-5), "mismatch (single-block)"

    # --- Exercise the row-tiled path too (force it by disabling single-block)
    S2 = 64
    x2 = jax.random.normal(key, (B, S2, D), dtype=jnp.float32)
    out2 = positional_embedding(x2, d_model=D, max_len=MAX_LEN,
                                single_block_max_bytes=0)
    out2 = jax.block_until_ready(out2)
    ref2 = reference(S2, D)
    assert out2.shape == (1, S2, D)
    assert jnp.allclose(out2, ref2, atol=1e-4, rtol=1e-5), "mismatch (tiled)"

    print("KERNEL_OK")
</pallas_src>

<mosaic_0001>
module attributes {stable_mosaic.version = 11 : i64} {
  func.func @pe_kernel(%arg0: i32, %arg1: memref<2x32xf32, #tpu.memory_space<vmem>>, %arg2: memref<8x32xf32, #tpu.memory_space<vmem>>) attributes {dimension_semantics = [#tpu.dimension_semantics<arbitrary>], iteration_bounds = array<i64: 1>, scalar_prefetch = 0 : i64, scratch_operands = 0 : i64, tpu.core_type = #tpu.core_type<tc>, window_params = [{pipeline_mode = #tpu.pipeline_mode<synchronous>, transform_indices = @transform_0, window_bounds = array<i64: 2, 32>}, {pipeline_mode = #tpu.pipeline_mode<synchronous>, transform_indices = @transform_1, window_bounds = array<i64: 8, 32>}]} {
    %c8_i32 = arith.constant 8 : i32
    %0 = arith.muli %arg0, %c8_i32 : i32
    %1 = tpu.iota {dimensions = array<i32: 0>} : vector<8x32xi32>
    %2 = vector.broadcast %0 : i32 to vector<8x32xi32>
    %3 = arith.addi %1, %2 : vector<8x32xi32>
    %4 = arith.sitofp %3 : vector<8x32xi32> to vector<8x32xf32>
    %c0 = arith.constant 0 : index
    %c0_0 = arith.constant 0 : index
    %5 = vector.load %arg1[%c0, %c0_0] : memref<2x32xf32, #tpu.memory_space<vmem>>, vector<1x32xf32>
    %c1 = arith.constant 1 : index
    %c0_1 = arith.constant 0 : index
    %6 = vector.load %arg1[%c1, %c0_1] : memref<2x32xf32, #tpu.memory_space<vmem>>, vector<1x32xf32>
    %7 = vector.broadcast %5 : vector<1x32xf32> to vector<8x32xf32>
    %8 = arith.mulf %4, %7 : vector<8x32xf32>
    %9 = vector.broadcast %6 : vector<1x32xf32> to vector<8x32xf32>
    %10 = arith.addf %8, %9 : vector<8x32xf32>
    %11 = math.sin %10 : vector<8x32xf32>
    %c0_2 = arith.constant 0 : index
    %c0_3 = arith.constant 0 : index
    %12 = vector.load %arg2[%c0_2, %c0_3] : memref<8x32xf32, #tpu.memory_space<vmem>>, vector<8x32xf32>
    tpu.vector_store %arg2[%c0_2, %c0_3], %11 {strides = array<i32>} : memref<8x32xf32, #tpu.memory_space<vmem>>, vector<8x32xf32>,
    return
  }
  func.func @transform_0(%arg0: i32) -> (i32, i32) {
    %c0_i32 = arith.constant 0 : i32
    %c0_i32_0 = arith.constant 0 : i32
    %c0_i32_1 = arith.constant 0 : i32
    return %c0_i32, %c0_i32_0 : i32, i32
  }
  func.func @transform_1(%arg0: i32) -> (i32, i32) {
    %c0_i32 = arith.constant 0 : i32
    %c0_i32_0 = arith.constant 0 : i32
    %c0_i32_1 = arith.constant 0 : i32
    return %c0_i32, %c0_i32_0 : i32, i32
  }
}

</mosaic_0001>

<bundles_post_ra>
// kernel: tpu_custom_call.1
= control target key start
LH: loop header
LB: loop body
LE: loop exit
PB: predicated region body
PF: predicated region fallthrough
CT: control target
= control target key end

     0   :  { %6 = vsyncpa [#allocation3], 0  ;;  %s293_s0 = inlined_call_operand.hbm [shape: f32[2,32], index: 0, kind: input, shape index: {}]   ;;  %s294_s1 = inlined_call_operand.hbm [shape: f32[8,32], index: 1, kind: output, shape index: {}]  }
   0x1   :  { %7 = vsyncpa [#allocation4], 0  ;;  %s230_s6 = smov [#allocation2]   ;;  %s182_s10 = scalar_lea.hbm %s293_s0, 32 }
   0x2   :  { %s14_s7 = sshll.u32 %s230_s6, 4  ;;  %p183_p0 = scmp.ne.s32.totalorder %s293_s0, %s182_s10  ;;  %s15_s7 = int_to_ptr.vmem [resolvable:$true] %s14_s7 }
   0x3   :  { %p186_p1 = scmp.lt.u32.totalorder %s182_s10, %s293_s0 }
   0x5   :  { %p188_p2 = pnand %p186_p1, %p183_p0 }
   0x7   :  { %191 = shalt.err (!%p188_p2)
}
   0x8   :  { %s192_s15 = scalar_lea.vmem %s15_s7, 32  ;;  %p197_p4 = scmp.lt.s32.totalorder %s15_s7, %s15_s7 }
   0x9   :  { %p193_p3 = scmp.ne.s32.totalorder %s15_s7, %s192_s15  ;;  %p198_p5 = scmp.lt.s32.totalorder %s192_s15, %s192_s15 }
   0xb   :  { %p199_p6 = por %p198_p5, %p197_p4 }
   0xd   :  { %p200_p7 = pnand %p199_p6, %p193_p3 }
   0xf   :  { %203 = shalt.err (!%p200_p7)
}
  0x10   :  { %17 = dma.hbm_to_vmem [thread:$0]  %s293_s0, 32, %s15_s7, [#allocation3]  }
  0x11   :  { %226 = dma.done.wait [#allocation3], 32  }
  0x12   :  { %227 = vsyncadd [#allocation3], 4294967264  ;;  %v22_v0 = vlaneseq  ;;  %v160_v3 = vld [vmem:[#allocation2] ss:$0 sm:$0xff]  ;;  %v161_v4 = vld [vmem:[#allocation2 + $0x1] ss:$0 sm:$0xff] }
  0x13   :  { %v231_v18 = vmov 683565275   ;;  %v232_v20 = vmov 2475754826   ;;  %v233_v22 = vmov 2131351028  }
  0x14   :  { %v23_v1 = vshrl.u32 %v22_v0, 7  ;;  %v234_v24 = vmov 2102212464   ;;  %v235_v26 = vmov 920167782   ;;  %s237_s0 = smov [#allocation5]  }
  0x15   :  { %v236_v33 = vmov 1326507024   ;;  %s151_s18 = sshll.u32 %s237_s0, 4  ;;  %vm143_vm13 = vcmask 261120   ;;  %s152_s18 = int_to_ptr.vmem [resolvable:$true] %s151_s18 }
  0x16   :  { %v26_v2 = vcvt.s32.f32 %v23_v1  ;;  %s204_s19 = scalar_lea.vmem %s152_s18, 128  ;;  %p209_p9 = scmp.lt.s32.totalorder %s152_s18, %s152_s18 }
  0x17   :  { %p205_p8 = scmp.ne.s32.totalorder %s152_s18, %s204_s19  ;;  %p210_p10 = scmp.lt.s32.totalorder %s204_s19, %s204_s19 }
  0x18   :  { %v33_v5 = vmul.f32 %v160_v3, %v26_v2 }
  0x19   :  { %p211_p11 = por %p210_p10, %p209_p9 }
  0x1a   :  { %v260_v6 = vadd.f32 %v161_v4, %v33_v5 }
  0x1b   :  { %p212_p12 = pnand %p211_p11, %p205_p8 }
  0x1c   :  { %v42_v7 = vand.u32 2139095040, %v260_v6  ;;  %v39_v9 = vand.u32 2147483647, %v260_v6  ;;  %vm41_vm7 = vcmp.lt.s32.totalorder %v260_v6, 0  ;;  %vm131_vm12 = vweird.f32 %v260_v6 }
  0x1e   :  { %v43_v8 = vshrl.u32 %v42_v7, 23  ;;  %v46_v12 = vand.u32 8388607, %v39_v9  ;;  %vm40_vm8 = vcmp.le.f32.partialorder %v39_v9, 0.7853982 }
  0x20   :  { %v162_v10 = vadd.s32 4294967169, %v43_v8  ;;  %v47_v15 = vor.u32 8388608, %v46_v12 }
  0x22   :  { %v49_v11 = vadd.s32 1, %v162_v10  ;;  %v87_v35 = vshll.u32 %v47_v15, 8 }
  0x24   :  { %vm50_vm0 = vcmp.gt.s32.totalorder %v49_v11, 0 }
  0x25   :  { %v51_v13 = vsel %vm50_vm0, %v49_v11, 0 }
  0x26   :  { %v53_v14 = vand.u32 31, %v51_v13  ;;  %v52_v16 = vshrl.u32 %v51_v13, 5 }
  0x28   :  { %v54_v17 = vsub.s32 32, %v53_v14  ;;  %v56_v19 = vshll.u32 %v231_v18, %v53_v14  ;;  %v59_v21 = vshll.u32 %v232_v20, %v53_v14  ;;  %v62_v23 = vshll.u32 %v233_v22, %v53_v14 }
  0x29   :  { %v65_v25 = vshll.u32 %v234_v24, %v53_v14  ;;  %v68_v27 = vshll.u32 %v235_v26, %v53_v14  ;;  %vm71_vm1 = vcmp.lt.s32.totalorder %v52_v16, 1  ;;  %vm74_vm2 = vcmp.lt.s32.totalorder %v52_v16, 4 }
  0x2a   :  { %v55_v28 = vshrl.u32 %v231_v18, %v54_v17  ;;  %v57_v29 = vshrl.u32 %v232_v20, %v54_v17  ;;  %v60_v30 = vshrl.u32 %v233_v22, %v54_v17  ;;  %v63_v31 = vshrl.u32 %v234_v24, %v54_v17 }
  0x2b   :  { %v66_v32 = vshrl.u32 %v235_v26, %v54_v17  ;;  %v69_v34 = vshrl.u32 %v236_v33, %v54_v17  ;;  %vm72_vm3 = vcmp.lt.s32.totalorder %v52_v16, 2  ;;  %vm73_vm4 = vcmp.lt.s32.totalorder %v52_v16, 3 }
  0x2c   :  { %v58_v36 = vor.u32 %v57_v29, %v56_v19  ;;  %v61_v37 = vor.u32 %v60_v30, %v59_v21  ;;  %v64_v38 = vor.u32 %v63_v31, %v62_v23 }
  0x2d   :  { %v67_v39 = vor.u32 %v66_v32, %v65_v25  ;;  %v70_v40 = vor.u32 %v69_v34, %v68_v27 }
  0x2e   :  { %v75_v41 = vsel %vm71_vm1, %v55_v28, %v58_v36  ;;  %v76_v42 = vsel %vm74_vm2, %v64_v38, 2102212464  ;;  %v79_v43 = vsel %vm71_vm1, %v58_v36, %v61_v37  ;;  %v83_v44 = vsel %vm71_vm1, %v61_v37, %v64_v38 }
  0x2f   :  { %v77_v45 = vsel %vm73_vm4, %v61_v37, %v76_v42  ;;  %v80_v46 = vsel %vm74_vm2, %v67_v39, 920167782  ;;  %v84_v47 = vsel %vm74_vm2, %v70_v40, 1326507024 }
  0x30   :  { %v81_v48 = vsel %vm73_vm4, %v64_v38, %v80_v46  ;;  %v85_v49 = vsel %vm73_vm4, %v67_v39, %v84_v47  ;;  %v78_v50 = vsel %vm72_vm3, %v75_v41, %v77_v45 }
  0x31   :  { %v82_v51 = vsel %vm72_vm3, %v79_v43, %v81_v48  ;;  %v86_v52 = vsel %vm72_vm3, %v83_v44, %v85_v49  ;;  %v94_v57 = vmul.u32 %v87_v35, %v78_v50 }
  0x32   :  { %v266_v53 = vmul.u32.u64.low %v87_v35, %v86_v52  ;;  %v267_v54 = vmul.u32.u64.high %v87_v35, %v86_v52, %v266_v53  ;;  %v269_v55 = vmul.u32.u64.low %v87_v35, %v82_v51  ;;  %v270_v56 = vmul.u32.u64.high %v87_v35, %v82_v51, %v269_v55 }
  0x34   :  { %vm96_vm5 = vc.u32 %v267_v54, %v269_v55  ;;  %v97_v58 = vadd.s32 1, %v270_v56  ;;  %v95_v5 = vadd.s32 %v269_v55, %v267_v54 }
  0x36   :  { %v98_v59 = vsel %vm96_vm5, %v97_v58, %v270_v56 }
  0x37   :  { %v99_v60 = vadd.s32 %v98_v59, %v94_v57 }
  0x39   :  { %v100_v61 = vadd.s32 536870912, %v99_v60 }
  0x3b   :  { %v101_v62 = vshrl.u32 %v100_v61, 30 }
  0x3d   :  { %v102_v63 = vshll.u32 %v101_v62, 30  ;;  %v125_v19 = vsub.s32 4, %v101_v62 }
  0x3f   :  { %v103_v0 = vsub.s32 %v99_v60, %v102_v63  ;;  %v126_v22 = vsel %vm41_vm7, %v125_v19, %v101_v62 }
  0x40   :  { %v128_v25 = vsel %vm40_vm8, 0, %v126_v22 }
  0x41   :  { %v105_v1 = vsub.s32 0, %v103_v0  ;;  %v132_v26 = vadd.s32 3, %v128_v25 }
  0x43   :  { %v163_v2 = vmin.u32 %v105_v1, %v103_v0  ;;  %v133_v27 = vand.u32 3, %v132_v26 }
  0x45   :  { %v107_v3 = vclz %v163_v2  ;;  %vm138_vm9 = vcmp.eq.s32.totalorder %v133_v27, 2  ;;  %vm135_vm10 = vcmp.eq.s32.totalorder %v133_v27, 0  ;;  %vm134_vm11 = vcmp.lt.s32.totalorder %v133_v27, 2 }
  0x47   :  { %v164_v4 = vadd.s32 4294967294, %v107_v3 }
  0x49   :  { %vm165_vm6 = vcmp.lt.s32.totalorder %v164_v4, 0 }
  0x4a   :  { %v110_v7 = vsel %vm165_vm6, 0, %v164_v4 }
  0x4b   :  { %v111_v8 = vsub.s32 32, %v110_v7  ;;  %v112_v10 = vshll.u32 %v103_v0, %v110_v7  ;;  %v115_v11 = vsub.s32 4294967266, %v110_v7 }
  0x4d   :  { %v113_v12 = vshrl.u32 %v95_v5, %v111_v8  ;;  %v116_v13 = vadd.s32 127, %v115_v11 }
  0x4f   :  { %v114_v14 = vor.u32 %v113_v12, %v112_v10  ;;  %v117_v15 = vshll.u32 %v116_v13, 23 }
  0x51   :  { %v118_v16 = vor.u32 4788187, %v117_v15  ;;  %v121_v17 = vcvt.s32.f32 %v114_v14 }
  0x53   :  { %v119_v18 = vand.u32 2147483647, %v118_v16 }
  0x55   :  { %v122_v20 = vmul.f32 %v121_v17, %v119_v18 }
  0x57   :  { %v123_v21 = vxor.u32 2147483648, %v122_v20 }
  0x59   :  { %v124_v23 = vsel %vm41_vm7, %v123_v21, %v122_v20 }
  0x5a   :  { %v127_v24 = vsel %vm40_vm8, %v260_v6, %v124_v23 }
  0x5b   :  { %178 = vcosq.f32 %v127_v24 }
  0x5c   :  { %180 = vsinq.f32 %v127_v24 }
  0x65   :  { %v179_v28 = vpop.eup %178 }
  0x66   :  { %v181_v29 = vpop.eup %180  ;;  %v139_v30 = vxor.u32 2147483648, %v179_v28 }
  0x67   :  { %v136_v31 = vxor.u32 2147483648, %v181_v29 }
  0x68   :  { %v140_v9 = vsel %vm138_vm9, %v139_v30, %v181_v29 }
  0x69   :  { %v137_v32 = vsel %vm135_vm10, %v179_v28, %v136_v31 }
  0x6a   :  { %v141_v33 = vsel %vm134_vm11, %v137_v32, %v140_v9 }
  0x6b   :  { %v142_v34 = vsel %vm131_vm12, nan, %v141_v33 }
  0x6c   :  { %144 = vst.msk [vmem:[#allocation5] sm:$0xff] %vm143_vm13, %v142_v34 }
  0x6d   :  { %215 = shalt.err (!%p212_p12)
}
  0x6e   :  { %s216_s22 = scalar_lea.hbm %s294_s1, 128 }
  0x6f   :  { %p217_p13 = scmp.ne.s32.totalorder %s294_s1, %s216_s22  ;;  %p220_p0 = scmp.lt.u32.totalorder %s216_s22, %s294_s1 }
  0x71   :  { %p222_p1 = pnand %p220_p0, %p217_p13 }
  0x73   :  { %225 = shalt.err (!%p222_p1)
}
  0x74   :  { %154 = dma.vmem_to_hbm [thread:$0]  %s152_s18, 128, %s294_s1, [#allocation4]  }
  0x75   :  { %228 = dma.done.wait [#allocation4], 128  }
  0x76   :  { %229 = vsyncadd [#allocation4], 4294967168 }
  0x77   :  { %158 = vsyncpa [#allocation3], 1 }
  0x78   :  { %159 = vsyncpa [#allocation4], 1 }

</bundles_post_ra>
